<compile_context>
chip_gen: v7x
topology: tpu7x:2x2x1
jax: 0.10.0
libtpu: 0.0.40
codegen_flags: <defaults>
</compile_context>

<pallas_src>
import functools
import math

import jax
import jax.numpy as jnp
from jax.experimental import pallas as pl
from jax.experimental.pallas import tpu as pltpu


# ----------------------------------------------------------------------------
# helpers
# ----------------------------------------------------------------------------
def _round_up(v, m):
    return ((v + m - 1) // m) * m


def _apply_act(y, act):
    if act == "relu":
        return jnp.maximum(y, 0.0)
    if act == "leaky":                      # nn.LeakyReLU(0.2) in the reference
        return jnp.where(y >= 0.0, y, 0.2 * y)
    if act == "tanh":
        return jnp.tanh(y)
    return y


# ----------------------------------------------------------------------------
# fused matmul kernel:  out = post_act( pre_act(A*ps+pb) @ B + ob )
# ----------------------------------------------------------------------------
def _mm_kernel(a_ref, b_ref, ps_ref, pb_ref, ob_ref, o_ref, acc_ref,
               *, pre_act, post_act):
    @pl.when(pl.program_id(2) == 0)
    def _():
        acc_ref[...] = jnp.zeros_like(acc_ref)

    a = _apply_act(a_ref[...] * ps_ref[...] + pb_ref[...], pre_act)
    acc_ref[...] += jnp.dot(a.astype(jnp.bfloat16), b_ref[...],
                            preferred_element_type=jnp.float32)

    @pl.when(pl.program_id(2) == pl.num_programs(2) - 1)
    def _():
        o_ref[...] = _apply_act(acc_ref[...] + ob_ref[...],
                                post_act).astype(o_ref.dtype)


# Tiling policy: single block whenever it fits comfortably in VMEM, otherwise
# modest tiles.  Worst per-call working set stays < ~8 MiB (fits v5e's 16 MiB
# scoped default and v7x's 64 MiB physical with big margin).
def _pick_m(M):
    Mp = _round_up(max(M, 1), 8)
    if Mp <= 1024:
        return Mp, Mp
    return _round_up(M, 1024), 1024


def _pick_k(K):
    Kp = _round_up(K, 128)
    if Kp <= 2560:
        return Kp, Kp
    return _round_up(K, 2048), 2048


def _pick_n(N):
    Np = _round_up(N, 128)
    if Np <= 1024:
        return Np, Np
    return _round_up(N, 512), 512


@functools.lru_cache(maxsize=None)
def _build_matmul(M, K, N, pre_act, post_act):
    Mp, TM = _pick_m(M)
    Kp, TK = _pick_k(K)
    Np, TN = _pick_n(N)
    grid = (Mp // TM, Np // TN, Kp // TK)

    call = pl.pallas_call(
        functools.partial(_mm_kernel, pre_act=pre_act, post_act=post_act),
        out_shape=jax.ShapeDtypeStruct((Mp, Np), jnp.float32),
        grid_spec=pltpu.PrefetchScalarGridSpec(
            num_scalar_prefetch=0,
            grid=grid,
            in_specs=[pl.BlockSpec((TM, TK), lambda i, j, k: (i, k)),
                      pl.BlockSpec((TK, TN), lambda i, j, k: (k, j)),
                      pl.BlockSpec((1, TK), lambda i, j, k: (0, k)),
                      pl.BlockSpec((1, TK), lambda i, j, k: (0, k)),
                      pl.BlockSpec((1, TN), lambda i, j, k: (0, j))],
            out_specs=pl.BlockSpec((TM, TN), lambda i, j, k: (i, j)),
            scratch_shapes=[pltpu.VMEM((TM, TN), jnp.float32)]),
        compiler_params=pltpu.CompilerParams(
            dimension_semantics=("parallel", "parallel", "arbitrary")),
    )

    def fn(a, bp, ps, pb, ob):
        ap = jnp.pad(a.astype(jnp.float32), ((0, Mp - M), (0, Kp - K)))
        psp = jnp.pad(ps.astype(jnp.float32).reshape(1, K), ((0, 0), (0, Kp - K)))
        pbp = jnp.pad(pb.astype(jnp.float32).reshape(1, K), ((0, 0), (0, Kp - K)))
        obp = jnp.pad(ob.astype(jnp.float32).reshape(1, N), ((0, 0), (0, Np - N)))
        return call(ap, bp, psp, pbp, obp)[:M, :N]

    return jax.jit(fn)


# ----------------------------------------------------------------------------
# fused per-channel affine (+ optional residual add) + activation kernels
# ----------------------------------------------------------------------------
def _affine_act_kernel(x_ref, s_ref, b_ref, o_ref, *, act):
    o_ref[...] = _apply_act(x_ref[...] * s_ref[...] + b_ref[...], act)


def _affine_add_act_kernel(x_ref, r_ref, s_ref, b_ref, o_ref, *, act):
    o_ref[...] = _apply_act(x_ref[...] * s_ref[...] + b_ref[...] + r_ref[...], act)


def _pick_rows(M):
    Mp = _round_up(max(M, 1), 8)
    if Mp <= 512:
        return Mp, Mp
    return _round_up(M, 512), 512


@functools.lru_cache(maxsize=None)
def _build_affine_act(M, C, act, with_add):
    Mp, TR = _pick_rows(M)
    Cp = _round_up(C, 128)
    grid = (Mp // TR,)
    if with_add:
        kernel = functools.partial(_affine_add_act_kernel, act=act)
        in_specs = [pl.BlockSpec((TR, Cp), lambda i: (i, 0)),
                    pl.BlockSpec((TR, Cp), lambda i: (i, 0)),
                    pl.BlockSpec((1, Cp), lambda i: (0, 0)),
                    pl.BlockSpec((1, Cp), lambda i: (0, 0))]
    else:
        kernel = functools.partial(_affine_act_kernel, act=act)
        in_specs = [pl.BlockSpec((TR, Cp), lambda i: (i, 0)),
                    pl.BlockSpec((1, Cp), lambda i: (0, 0)),
                    pl.BlockSpec((1, Cp), lambda i: (0, 0))]

    call = pl.pallas_call(
        kernel,
        out_shape=jax.ShapeDtypeStruct((Mp, Cp), jnp.float32),
        grid_spec=pltpu.PrefetchScalarGridSpec(
            num_scalar_prefetch=0, grid=grid,
            in_specs=in_specs,
            out_specs=pl.BlockSpec((TR, Cp), lambda i: (i, 0))),
        compiler_params=pltpu.CompilerParams(
            dimension_semantics=("parallel",)),
    )

    def fn(x, *rest):
        xp = jnp.pad(x.astype(jnp.float32), ((0, Mp - M), (0, Cp - C)))
        if with_add:
            r, s, b = rest
            rp = jnp.pad(r.astype(jnp.float32), ((0, Mp - M), (0, Cp - C)))
            sp = jnp.pad(s.astype(jnp.float32).reshape(1, C), ((0, 0), (0, Cp - C)))
            bp = jnp.pad(b.astype(jnp.float32).reshape(1, C), ((0, 0), (0, Cp - C)))
            return call(xp, rp, sp, bp)[:M, :C]
        s, b = rest
        sp = jnp.pad(s.astype(jnp.float32).reshape(1, C), ((0, 0), (0, Cp - C)))
        bp = jnp.pad(b.astype(jnp.float32).reshape(1, C), ((0, 0), (0, Cp - C)))
        return call(xp, sp, bp)[:M, :C]

    return jax.jit(fn)


# ----------------------------------------------------------------------------
# NN building blocks (NHWC) on top of the Pallas kernels
# ----------------------------------------------------------------------------
def prep_conv(w4d):
    """Reshape (KH,KW,Cin,Cout) -> padded bf16 (Kp,Np) matmul weight, ONCE at init."""
    KH, KW, Cin, Cout = w4d.shape
    K, N = KH * KW * Cin, Cout
    Kp, _ = _pick_k(K)
    Np, _ = _pick_n(N)
    wp = jnp.pad(w4d.reshape(K, N), ((0, Kp - K), (0, Np - N))).astype(jnp.bfloat16)
    return {"wp": wp, "kh": KH, "kw": KW, "cin": Cin, "cout": Cout, "K": K}


def conv2d(x, wd, stride=1, padding=0,
           pre_scale=None, pre_shift=None, pre_act="none",
           out_bias=None, out_act="none"):
    """nn.Conv2d (cross-correlation), optionally fused with a preceding per-channel
    affine+activation (BN+ReLU) and/or a bias+activation epilogue."""
    Nb, H, W, Cin = x.shape
    KH, KW, Cout, K = wd["kh"], wd["kw"], wd["cout"], wd["K"]
    Ho = (H + 2 * padding - KH) // stride + 1
    Wo = (W + 2 * padding - KW) // stride + 1

    if pre_scale is None:
        pre_scale = jnp.ones((K,), jnp.float32)
        pre_shift = jnp.zeros((K,), jnp.float32)
        pre_act = "none"
    else:
        # pre-fusion only commutes with spatial zero-padding for 1x1 convs
        assert KH == 1 and KW == 1 and padding == 0 and stride == 1
    if out_bias is None:
        out_bias = jnp.zeros((Cout,), jnp.float32)

    if KH == 1 and KW == 1 and stride == 1 and padding == 0:
        patches = x.reshape(Nb * H * W, Cin)
    else:
        # TODO(synk): im2col materializes KH*KW patches in HBM; streaming the taps
        # through the matmul K-loop would avoid this (left as plain-JAX glue).
        xp = jnp.pad(x, ((0, 0), (padding, padding), (padding, padding), (0, 0)))
        cols = []
        for kh in range(KH):
            for kw in range(KW):
                sl = jax.lax.slice(
                    xp, (0, kh, kw, 0),
                    (Nb, kh + stride * (Ho - 1) + 1,
                     kw + stride * (Wo - 1) + 1, Cin),
                    (1, stride, stride, 1))
                cols.append(sl)
        patches = jnp.concatenate(cols, axis=-1).reshape(Nb * Ho * Wo, K)

    M = patches.shape[0]
    fn = _build_matmul(M, K, Cout, pre_act, out_act)
    out = fn(patches, wd["wp"], pre_scale, pre_shift, out_bias)
    return out.reshape(Nb, Ho, Wo, Cout)


def bn_scale_shift(x, bn, eps=1e-5):
    """BatchNorm2d training-mode (batch statistics) folded into per-channel scale/shift."""
    mean = jnp.mean(x, axis=(0, 1, 2))
    var = jnp.maximum(jnp.mean(jnp.square(x), axis=(0, 1, 2)) - jnp.square(mean), 0.0)
    scale = bn["g"] * jax.lax.rsqrt(var + eps)
    shift = bn["b"] - mean * scale
    return scale, shift


def batchnorm_act(x, bn, act="none"):
    s, b = bn_scale_shift(x, bn)
    Nb, H, W, C = x.shape
    fn = _build_affine_act(Nb * H * W, C, act, False)
    return fn(x.reshape(Nb * H * W, C), s, b).reshape(Nb, H, W, C)


def batchnorm_add_act(x, res, bn, act="relu"):
    """act(BN(x) + res) in one fused Pallas pass (BasicBlock_res tail)."""
    s, b = bn_scale_shift(x, bn)
    Nb, H, W, C = x.shape
    M = Nb * H * W
    fn = _build_affine_act(M, C, act, True)
    return fn(x.reshape(M, C), res.reshape(M, C), s, b).reshape(Nb, H, W, C)


def avg_pool(x, k):
    Nb, H, W, C = x.shape
    return x.reshape(Nb, H // k, k, W // k, k, C).mean(axis=(2, 4))


def upsample_nearest(x, factor):
    return jnp.repeat(jnp.repeat(x, factor, axis=1), factor, axis=2)


def max_pool_3x3_s2_p1(x):
    # TODO(synk): MaxPool2d(3, stride=2, padding=1) uses lax.reduce_window, not Pallas.
    return jax.lax.reduce_window(
        x, -jnp.inf, jax.lax.max,
        window_dimensions=(1, 3, 3, 1),
        window_strides=(1, 2, 2, 1),
        padding=((0, 0), (1, 1), (1, 1), (0, 0)))


# ----------------------------------------------------------------------------
# Parameter initialization (deterministic, synthetic)
# ----------------------------------------------------------------------------
_GROWTH = 48
_BN_SIZE = 4
_INIT_FEAT = 96

_key_counter = [0]


def _next_key():
    _key_counter[0] += 1
    return jax.random.fold_in(jax.random.PRNGKey(0), _key_counter[0])


def init_conv(kh, kw, cin, cout):
    fan_in = kh * kw * cin
    w = (jax.random.normal(_next_key(), (kh, kw, cin, cout), jnp.float32)
         * (1.0 / math.sqrt(fan_in)))
    return prep_conv(w)


def init_bn(c):
    return {"g": jnp.ones((c,), jnp.float32), "b": jnp.zeros((c,), jnp.float32)}


def init_dense_layer(cin):
    inter = _BN_SIZE * _GROWTH
    return dict(bn1=init_bn(cin), conv1=init_conv(1, 1, cin, inter),
                bn2=init_bn(inter), conv2=init_conv(3, 3, inter, _GROWTH))


def init_dense_block(cin, nlayers):
    layers, c = [], cin
    for _ in range(nlayers):
        layers.append(init_dense_layer(c))
        c += _GROWTH
    return layers, c


def init_transition(cin, cout):
    return dict(bn=init_bn(cin), conv=init_conv(1, 1, cin, cout))


def init_bottleneck(cin, cout):
    inter = cout * 4
    return dict(bn1=init_bn(cin), conv1=init_conv(1, 1, cin, inter),
                bn2=init_bn(inter), conv2=init_conv(3, 3, inter, cout))


def init_transblock(cin, cout):
    # ConvTranspose2d(k=1, s=1, p=0, no bias) == 1x1 conv with (Cin -> Cout) weight.
    return dict(bn=init_bn(cin), conv=init_conv(1, 1, cin, cout))


def init_basicres(c):
    return dict(conv1=init_conv(3, 3, c, c), bn1=init_bn(c),
                conv2=init_conv(3, 3, c, c), bn2=init_bn(c))


def init_params():
    p = {}
    # DenseNet-161 features actually used by the reference forward().
    p["conv0"] = init_conv(7, 7, 3, _INIT_FEAT)
    p["norm0"] = init_bn(_INIT_FEAT)
    c = _INIT_FEAT
    p["db1"], c = init_dense_block(c, 6)            # 96  -> 384
    p["tr1"] = init_transition(c, c // 2); c //= 2  # 192
    p["db2"], c = init_dense_block(c, 12)           # 192 -> 768
    p["tr2"] = init_transition(c, c // 2); c //= 2  # 384
    p["db3"], c = init_dense_block(c, 36)           # 384 -> 2112
    p["tr3"] = init_transition(c, c // 2); c //= 2  # 1056
    # decoder
    p["res31"] = init_basicres(1056)
    p["res32"] = init_basicres(1056)
    p["db4"] = init_bottleneck(1056, 528)
    p["tb4"] = init_transblock(1056 + 528, 256)
    p["res41"] = init_basicres(643)
    p["res42"] = init_basicres(643)
    p["db5"] = init_bottleneck(643, 512)
    p["tb5"] = init_transblock(1155, 256)
    p["res51"] = init_basicres(451)
    p["res52"] = init_basicres(451)
    p["db6"] = init_bottleneck(451, 256)
    p["tb6"] = init_transblock(707, 128)
    p["res61"] = init_basicres(131)
    p["res62"] = init_basicres(131)
    p["db7"] = init_bottleneck(131, 128)
    p["tb7"] = init_transblock(259, 64)
    p["res71"] = init_basicres(67)
    p["res72"] = init_basicres(67)
    p["db8"] = init_bottleneck(67, 64)
    p["tb8"] = init_transblock(131, 32)
    p["conv_refin"] = init_conv(3, 3, 35, 36)
    p["conv_refin_b"] = jnp.zeros((36,), jnp.float32)
    p["bn20"] = init_bn(36)
    for name in ("conv1010", "conv1020", "conv1030", "conv1040"):
        p[name] = init_conv(1, 1, 36, 1)
        p[name + "_b"] = jnp.zeros((1,), jnp.float32)
    p["refine3"] = init_conv(3, 3, 40, 3)
    p["refine3_b"] = jnp.zeros((3,), jnp.float32)
    # NOTE: denseblock4/norm5/resref1/resref2/pool1/pool2/batchnorm1 are unused
    # in the reference forward() and therefore not instantiated.
    return p


# ----------------------------------------------------------------------------
# Module forward functions
# ----------------------------------------------------------------------------
def dense_layer_fwd(p, x):
    s1, b1 = bn_scale_shift(x, p["bn1"])
    out = conv2d(x, p["conv1"], pre_scale=s1, pre_shift=b1, pre_act="relu")
    out = batchnorm_act(out, p["bn2"], "relu")
    out = conv2d(out, p["conv2"], padding=1)
    return jnp.concatenate([x, out], axis=-1)


def dense_block_fwd(layers, x):
    for lp in layers:
        x = dense_layer_fwd(lp, x)
    return x


def transition_fwd(p, x):
    s, b = bn_scale_shift(x, p["bn"])
    out = conv2d(x, p["conv"], pre_scale=s, pre_shift=b, pre_act="relu")
    return avg_pool(out, 2)


def bottleneck_fwd(p, x):
    s1, b1 = bn_scale_shift(x, p["bn1"])
    out = conv2d(x, p["conv1"], pre_scale=s1, pre_shift=b1, pre_act="relu")
    out = batchnorm_act(out, p["bn2"], "relu")
    out = conv2d(out, p["conv2"], padding=1)
    return jnp.concatenate([x, out], axis=-1)


def transblock_fwd(p, x):
    s, b = bn_scale_shift(x, p["bn"])
    out = conv2d(x, p["conv"], pre_scale=s, pre_shift=b, pre_act="relu")
    return upsample_nearest(out, 2)


def basicres_fwd(p, x):
    out = conv2d(x, p["conv1"], padding=1)
    out = batchnorm_act(out, p["bn1"], "relu")
    out = conv2d(out, p["conv2"], padding=1)
    return batchnorm_add_act(out, x, p["bn2"], "relu")   # relu(bn2(out) + x)


def forward(params, x_nchw):
    """Dense_rain_cvprw3_dense161.forward. Input/output NCHW (like PyTorch)."""
    x = jnp.transpose(x_nchw, (0, 2, 3, 1)).astype(jnp.float32)   # -> NHWC

    x0 = conv2d(x, params["conv0"], stride=2, padding=3)
    x0 = batchnorm_act(x0, params["norm0"], "relu")
    x0 = max_pool_3x3_s2_p1(x0)

    x1 = dense_block_fwd(params["db1"], x0)
    x1 = transition_fwd(params["tr1"], x1)
    x2 = transition_fwd(params["tr2"], dense_block_fwd(params["db2"], x1))
    x3 = transition_fwd(params["tr3"], dense_block_fwd(params["db3"], x2))
    x3 = basicres_fwd(params["res31"], x3)
    x3 = basicres_fwd(params["res32"], x3)

    x4 = transblock_fwd(params["tb4"], bottleneck_fwd(params["db4"], x3))
    x43 = avg_pool(x, 16)
    x42 = jnp.concatenate([x4, x2, x43], axis=-1)
    x42 = basicres_fwd(params["res41"], x42)
    x42 = basicres_fwd(params["res42"], x42)

    x5 = transblock_fwd(params["tb5"], bottleneck_fwd(params["db5"], x42))
    x53 = avg_pool(x, 8)
    x52 = jnp.concatenate([x5, x1, x53], axis=-1)
    x52 = basicres_fwd(params["res51"], x52)
    x52 = basicres_fwd(params["res52"], x52)

    x6 = transblock_fwd(params["tb6"], bottleneck_fwd(params["db6"], x52))
    x63 = avg_pool(x, 4)
    x62 = jnp.concatenate([x6, x63], axis=-1)
    x62 = basicres_fwd(params["res61"], x62)
    x6 = basicres_fwd(params["res62"], x62)

    x7 = transblock_fwd(params["tb7"], bottleneck_fwd(params["db7"], x6))
    x73 = avg_pool(x, 2)
    x72 = jnp.concatenate([x7, x73], axis=-1)
    x72 = basicres_fwd(params["res71"], x72)
    x7 = basicres_fwd(params["res72"], x72)

    x8 = transblock_fwd(params["tb8"], bottleneck_fwd(params["db8"], x7))
    x8 = jnp.concatenate([x8, x], axis=-1)

    x9 = conv2d(x8, params["conv_refin"], padding=1,
                out_bias=params["conv_refin_b"])
    x9 = batchnorm_act(x9, params["bn20"], "leaky")

    H = x9.shape[1]
    x101 = avg_pool(x9, 32)
    x102 = avg_pool(x9, 16)
    x103 = avg_pool(x9, 8)
    x104 = avg_pool(x9, 4)

    def head(xp, name):
        # 1x1 conv with bias + LeakyReLU fused in the matmul epilogue
        y = conv2d(xp, params[name], out_bias=params[name + "_b"], out_act="leaky")
        return upsample_nearest(y, H // y.shape[1])

    dehaze = jnp.concatenate(
        [head(x101, "conv1010"), head(x102, "conv1020"),
         head(x103, "conv1030"), head(x104, "conv1040"), x9], axis=-1)
    residual = conv2d(dehaze, params["refine3"], padding=1,
                      out_bias=params["refine3_b"], out_act="tanh")
    return jnp.transpose(residual, (0, 3, 1, 2))   # -> NCHW


# ----------------------------------------------------------------------------
if __name__ == "__main__":
    # Smallest spatial size compatible with the forward pass: H, W multiple of 32.
    x = jax.random.normal(jax.random.PRNGKey(0), (1, 3, 32, 32), jnp.float32)
    params = init_params()
    out = forward(params, x)
    out = jax.block_until_ready(out)
    assert out.shape == (1, 3, 32, 32), out.shape
    assert bool(jnp.all(jnp.isfinite(out)))
    print("KERNEL_OK")
</pallas_src>

<mosaic_0001>
module attributes {stable_mosaic.version = 11 : i64} {
  func.func @_mm_kernel(%arg0: i32, %arg1: i32, %arg2: i32, %arg3: memref<256x256xf32, #tpu.memory_space<vmem>>, %arg4: memref<256x128xbf16, #tpu.memory_space<vmem>>, %arg5: memref<1x256xf32, #tpu.memory_space<vmem>>, %arg6: memref<1x256xf32, #tpu.memory_space<vmem>>, %arg7: memref<1x128xf32, #tpu.memory_space<vmem>>, %arg8: memref<256x128xf32, #tpu.memory_space<vmem>>, %arg9: memref<256x128xf32, #tpu.memory_space<vmem>>) attributes {dimension_semantics = [#tpu.dimension_semantics<parallel>, #tpu.dimension_semantics<parallel>, #tpu.dimension_semantics<arbitrary>], iteration_bounds = array<i64: 1, 1, 1>, scalar_prefetch = 0 : i64, scratch_operands = 1 : i64, tpu.core_type = #tpu.core_type<tc>, window_params = [{transform_indices = @transform_0, window_bounds = array<i64: 256, 256>}, {transform_indices = @transform_1, window_bounds = array<i64: 256, 128>}, {transform_indices = @transform_2, window_bounds = array<i64: 1, 256>}, {transform_indices = @transform_3, window_bounds = array<i64: 1, 256>}, {transform_indices = @transform_4, window_bounds = array<i64: 1, 128>}, {transform_indices = @transform_5, window_bounds = array<i64: 256, 128>}]} {
    %c0_i32 = arith.constant 0 : i32
    %0 = arith.cmpi eq, %arg2, %c0_i32 : i32
    %1 = arith.extui %0 : i1 to i32
    %c0_i32_0 = arith.constant 0 : i32
    %2 = arith.cmpi ne, %1, %c0_i32_0 : i32
    scf.if %2 {
      %cst_14 = arith.constant 0.000000e+00 : f32
      %19 = vector.broadcast %cst_14 : f32 to vector<256x128xf32>
      %c0_15 = arith.constant 0 : index
      %c0_16 = arith.constant 0 : index
      %20 = vector.load %arg9[%c0_15, %c0_16] : memref<256x128xf32, #tpu.memory_space<vmem>>, vector<256x128xf32>
      tpu.vector_store %arg9[%c0_15, %c0_16], %19 {strides = array<i32>} : memref<256x128xf32, #tpu.memory_space<vmem>>, vector<256x128xf32>,
    } else {
    }
    %c0 = arith.constant 0 : index
    %c0_1 = arith.constant 0 : index
    %3 = vector.load %arg3[%c0, %c0_1] : memref<256x256xf32, #tpu.memory_space<vmem>>, vector<256x256xf32>
    %c0_2 = arith.constant 0 : index
    %c0_3 = arith.constant 0 : index
    %4 = vector.load %arg5[%c0_2, %c0_3] : memref<1x256xf32, #tpu.memory_space<vmem>>, vector<1x256xf32>
    %5 = vector.broadcast %4 : vector<1x256xf32> to vector<256x256xf32>
    %6 = arith.mulf %3, %5 : vector<256x256xf32>
    %c0_4 = arith.constant 0 : index
    %c0_5 = arith.constant 0 : index
    %7 = vector.load %arg6[%c0_4, %c0_5] : memref<1x256xf32, #tpu.memory_space<vmem>>, vector<1x256xf32>
    %8 = vector.broadcast %7 : vector<1x256xf32> to vector<256x256xf32>
    %9 = arith.addf %6, %8 : vector<256x256xf32>
    %c0_6 = arith.constant 0 : index
    %c0_7 = arith.constant 0 : index
    %10 = vector.load %arg9[%c0_6, %c0_7] : memref<256x128xf32, #tpu.memory_space<vmem>>, vector<256x128xf32>
    %11 = arith.truncf %9 : vector<256x256xf32> to vector<256x256xbf16>
    %c0_8 = arith.constant 0 : index
    %c0_9 = arith.constant 0 : index
    %12 = vector.load %arg4[%c0_8, %c0_9] : memref<256x128xbf16, #tpu.memory_space<vmem>>, vector<256x128xbf16>
    %cst = arith.constant dense<0.000000e+00> : vector<256x128xf32>
    %13 = tpu.matmul %11, %12, %cst {dimension_numbers = #tpu.dot_dimension_numbers<[1], [0], [0], [1], [0, 0, 1, 1], [], []>} : vector<256x256xbf16>, vector<256x128xbf16>, vector<256x128xf32> -> vector<256x128xf32>
    %14 = arith.addf %10, %13 : vector<256x128xf32>
    %c0_10 = arith.constant 0 : index
    %c0_11 = arith.constant 0 : index
    %15 = vector.load %arg9[%c0_10, %c0_11] : memref<256x128xf32, #tpu.memory_space<vmem>>, vector<256x128xf32>
    tpu.vector_store %arg9[%c0_10, %c0_11], %14 {strides = array<i32>} : memref<256x128xf32, #tpu.memory_space<vmem>>, vector<256x128xf32>,
    %c0_i32_12 = arith.constant 0 : i32
    %16 = arith.cmpi eq, %arg2, %c0_i32_12 : i32
    %17 = arith.extui %16 : i1 to i32
    %c0_i32_13 = arith.constant 0 : i32
    %18 = arith.cmpi ne, %17, %c0_i32_13 : i32
    scf.if %18 {
      %c0_14 = arith.constant 0 : index
      %c0_15 = arith.constant 0 : index
      %19 = vector.load %arg9[%c0_14, %c0_15] : memref<256x128xf32, #tpu.memory_space<vmem>>, vector<256x128xf32>
      %c0_16 = arith.constant 0 : index
      %c0_17 = arith.constant 0 : index
      %20 = vector.load %arg7[%c0_16, %c0_17] : memref<1x128xf32, #tpu.memory_space<vmem>>, vector<1x128xf32>
      %21 = vector.broadcast %20 : vector<1x128xf32> to vector<256x128xf32>
      %22 = arith.addf %19, %21 : vector<256x128xf32>
      %c0_18 = arith.constant 0 : index
      %c0_19 = arith.constant 0 : index
      %23 = vector.load %arg8[%c0_18, %c0_19] : memref<256x128xf32, #tpu.memory_space<vmem>>, vector<256x128xf32>
      tpu.vector_store %arg8[%c0_18, %c0_19], %22 {strides = array<i32>} : memref<256x128xf32, #tpu.memory_space<vmem>>, vector<256x128xf32>,
    } else {
    }
    return
  }
  func.func @transform_0(%arg0: i32, %arg1: i32, %arg2: i32) -> (i32, i32) {
    %c0_i32 = arith.constant 0 : i32
    return %arg0, %arg2 : i32, i32
  }
  func.func @transform_1(%arg0: i32, %arg1: i32, %arg2: i32) -> (i32, i32) {
    %c0_i32 = arith.constant 0 : i32
    return %arg2, %arg1 : i32, i32
  }
  func.func @transform_2(%arg0: i32, %arg1: i32, %arg2: i32) -> (i32, i32) {
    %c0_i32 = arith.constant 0 : i32
    %c0_i32_0 = arith.constant 0 : i32
    return %c0_i32, %arg2 : i32, i32
  }
  func.func @transform_3(%arg0: i32, %arg1: i32, %arg2: i32) -> (i32, i32) {
    %c0_i32 = arith.constant 0 : i32
    %c0_i32_0 = arith.constant 0 : i32
    return %c0_i32, %arg2 : i32, i32
  }
  func.func @transform_4(%arg0: i32, %arg1: i32, %arg2: i32) -> (i32, i32) {
    %c0_i32 = arith.constant 0 : i32
    %c0_i32_0 = arith.constant 0 : i32
    return %c0_i32, %arg1 : i32, i32
  }
  func.func @transform_5(%arg0: i32, %arg1: i32, %arg2: i32) -> (i32, i32) {
    %c0_i32 = arith.constant 0 : i32
    return %arg0, %arg1 : i32, i32
  }
}

</mosaic_0001>

<bundles_post_ra>
// kernel: fn.1
= control target key start
LH: loop header
LB: loop body
LE: loop exit
PB: predicated region body
PF: predicated region fallthrough
CT: control target
= control target key end

     0   :  { %v123_v5 = vlaneseq  ;;  %s1506_s1 = inlined_call_operand.vmem [shape: bf16[256,128], index: 1, kind: input, shape index: {}]   ;;  %s1507_s0 = inlined_call_operand.vmem [shape: f32[256,256], index: 0, kind: input, shape index: {}]   ;;  %s1508_s2 = inlined_call_operand.vmem [shape: f32[1,256], index: 2, kind: input, shape index: {}]   ;;  %s1509_s3 = inlined_call_operand.vmem [shape: f32[1,256], index: 3, kind: input, shape index: {}]   ;;  %s1510_s4 = inlined_call_operand.vmem [shape: f32[1,128], index: 4, kind: input, shape index: {}]   ;;  %s1511_s5 = inlined_call_operand.vmem [shape: f32[256,128], index: 5, kind: output, shape index: {}]  }
   0x1   :  { %v945_v0 = vld [vmem:[%s1506_s1 + $0x40] sm:$0xff]   ;;  %v947_v2 = vld [vmem:[%s1506_s1 + $0x48] sm:$0xff]   ;;  %v949_v4 = vld [vmem:[%s1506_s1 + $0x50] sm:$0xff]  }
   0x2   :  { %v946_v1 = vld [vmem:[%s1506_s1] sm:$0xff]   ;;  %817 = vmatprep.subr.bf16.mxu0 %v945_v0  ;;  %929 = vmatprep.subr.bf16.mxu1 %v945_v0  ;;  %v948_v3 = vld [vmem:[%s1506_s1 + $0x8] sm:$0xff]   ;;  %v950_v6 = vld [vmem:[%s1506_s1 + $0x10] sm:$0xff]   ;;  %v124_v8 = vshrl.u32 %v123_v5, 7 }
   0x3   :  { %818 = vmatpush3.bf16.msra.mxu0 %v946_v1  ;;  %937 = vmatpush3.bf16.msra.mxu1 %v946_v1  ;;  %v951_v7 = vld [vmem:[%s1506_s1 + $0x58] sm:$0xff]   ;;  %v953_v10 = vld [vmem:[%s1506_s1 + $0x60] sm:$0xff]   ;;  %v955_v14 = vld [vmem:[%s1506_s1 + $0x68] sm:$0xff]  }
   0x4   :  { %819 = vmatprep.subr.bf16.mxu0 %v947_v2  ;;  %930 = vmatprep.subr.bf16.mxu1 %v947_v2  ;;  %v952_v9 = vld [vmem:[%s1506_s1 + $0x18] sm:$0xff]   ;;  %v125_v11 = vsub.s32 0, %v124_v8  ;;  %v129_v12 = vsub.s32 1, %v124_v8  ;;  %v954_v13 = vld [vmem:[%s1506_s1 + $0x20] sm:$0xff]   ;;  %v58_v15 = vld [vmem:[%s1507_s0 + $0x8] sm:$0xff] }
   0x5   :  { %v60_v16 = vld [vmem:[%s1507_s0 + $0x18] sm:$0xff]  ;;  %v121_v17 = vld [vmem:[%s1508_s2] sm:$0x3]  ;;  %v90_v21 = vld [vmem:[%s1507_s0 + $0x108] sm:$0xff] }
   0x6   :  { %v1033_v18 = vrot.slane %v121_v17, %v125_v11  ;;  %v1035_v19 = vrot.slane %v121_v17, %v129_v12  ;;  %v197_v20 = vld [vmem:[%s1509_s3] sm:$0x3]  ;;  %v92_v22 = vld [vmem:[%s1507_s0 + $0x118] sm:$0xff]  ;;  %v59_v26 = vld [vmem:[%s1507_s0 + $0x10] sm:$0xff] }
   0x7   :  { %820 = vmatpush3.bf16.msra.mxu0 %v948_v3  ;;  %938 = vmatpush3.bf16.msra.mxu1 %v948_v3  ;;  %v1046_v23 = vrot.slane %v197_v20, %v125_v11  ;;  %v1048_v24 = vrot.slane %v197_v20, %v129_v12  ;;  %v57_v25 = vld [vmem:[%s1507_s0] sm:$0xff]  ;;  %v956_v27 = vld [vmem:[%s1506_s1 + $0x28] sm:$0xff]   ;;  %v91_v32 = vld [vmem:[%s1507_s0 + $0x110] sm:$0xff] }
   0x8   :  { %821 = vmatprep.subr.bf16.mxu0 %v949_v4  ;;  %931 = vmatprep.subr.bf16.mxu1 %v949_v4  ;;  %v134_v28 = vmul.f32 %v1035_v19, %v58_v15  ;;  %v136_v29 = vmul.f32 %v1035_v19, %v60_v16  ;;  %v166_v30 = vmul.f32 %v1035_v19, %v90_v21  ;;  %v89_v31 = vld [vmem:[%s1507_s0 + $0x100] sm:$0xff]  ;;  %v957_v33 = vld [vmem:[%s1506_s1 + $0x70] sm:$0xff]   ;;  %v62_v37 = vld [vmem:[%s1507_s0 + $0x28] sm:$0xff] }
   0x9   :  { %v168_v34 = vmul.f32 %v1035_v19, %v92_v22  ;;  %v133_v35 = vmul.f32 %v1033_v18, %v57_v25  ;;  %v135_v36 = vmul.f32 %v1033_v18, %v59_v26  ;;  %v165_v42 = vmul.f32 %v1033_v18, %v89_v31  ;;  %v64_v44 = vld [vmem:[%s1507_s0 + $0x38] sm:$0xff]  ;;  %v94_v45 = vld [vmem:[%s1507_s0 + $0x128] sm:$0xff]  ;;  %v958_v47 = vld [vmem:[%s1506_s1 + $0x30] sm:$0xff]  }
   0xa   :  { %v210_v38 = vadd.f32 %v1048_v24, %v134_v28  ;;  %v212_v39 = vadd.f32 %v1048_v24, %v136_v29  ;;  %v242_v40 = vadd.f32 %v1048_v24, %v166_v30  ;;  %v167_v43 = vmul.f32 %v1033_v18, %v91_v32  ;;  %v96_v46 = vld [vmem:[%s1507_s0 + $0x138] sm:$0xff]  ;;  %v61_v57 = vld [vmem:[%s1507_s0 + $0x20] sm:$0xff]  ;;  %v63_v61 = vld [vmem:[%s1507_s0 + $0x30] sm:$0xff] }
   0xb   :  { %822 = vmatpush3.bf16.msra.mxu0 %v950_v6  ;;  %939 = vmatpush3.bf16.msra.mxu1 %v950_v6  ;;  %v244_v41 = vadd.f32 %v1048_v24, %v168_v34  ;;  %v138_v49 = vmul.f32 %v1035_v19, %v62_v37  ;;  %v959_v50 = vld [vmem:[%s1506_s1 + $0x78] sm:$0xff]   ;;  %v209_v52 = vadd.f32 %v1046_v23, %v133_v35  ;;  %v93_v62 = vld [vmem:[%s1507_s0 + $0x120] sm:$0xff]  ;;  %v95_v63 = vld [vmem:[%s1507_s0 + $0x130] sm:$0xff] }
   0xc   :  { %823 = vmatprep.subr.bf16.mxu0 %v951_v7  ;;  %932 = vmatprep.subr.bf16.mxu1 %v951_v7  ;;  %v306_v48 = vpack.c.bf16 %v212_v39, %v210_v38  ;;  %v211_v53 = vadd.f32 %v1046_v23, %v135_v36  ;;  %v140_v54 = vmul.f32 %v1035_v19, %v64_v44  ;;  %v960_v0 = vld [vmem:[%s1506_s1 + $0x38] sm:$0xff]   ;;  %v66_v4 = vld [vmem:[%s1507_s0 + $0x48] sm:$0xff]  ;;  %v65_v30 = vld [vmem:[%s1507_s0 + $0x40] sm:$0xff] }
   0xd   :  { %v322_v51 = vpack.c.bf16 %v244_v41, %v242_v40  ;;  %v170_v55 = vmul.f32 %v1035_v19, %v94_v45  ;;  %v172_v56 = vmul.f32 %v1035_v19, %v96_v46  ;;  %v241_v58 = vadd.f32 %v1046_v23, %v165_v42  ;;  %v68_v5 = vld [vmem:[%s1507_s0 + $0x58] sm:$0xff]  ;;  %v98_v7 = vld [vmem:[%s1507_s0 + $0x148] sm:$0xff]  ;;  %v67_v31 = vld [vmem:[%s1507_s0 + $0x50] sm:$0xff] }
   0xe   :  { %497 = vmatprep.mubr.bf16.mxu0 %v306_v48  ;;  %v243_v59 = vadd.f32 %v1046_v23, %v167_v43  ;;  %v214_v60 = vadd.f32 %v1048_v24, %v138_v49  ;;  %v216_v1 = vadd.f32 %v1048_v24, %v140_v54  ;;  %v305_v6 = vpack.c.bf16 %v211_v53, %v209_v52  ;;  %v100_v8 = vld [vmem:[%s1507_s0 + $0x158] sm:$0xff]  ;;  %v97_v34 = vld [vmem:[%s1507_s0 + $0x140] sm:$0xff]  ;;  %v99_v35 = vld [vmem:[%s1507_s0 + $0x150] sm:$0xff] }
   0xf   :  { %824 = vmatpush3.bf16.msra.mxu0 %v952_v9  ;;  %940 = vmatpush3.bf16.msra.mxu1 %v952_v9  ;;  %v246_v2 = vadd.f32 %v1048_v24, %v170_v55  ;;  %v248_v3 = vadd.f32 %v1048_v24, %v172_v56  ;;  %v137_v9 = vmul.f32 %v1033_v18, %v61_v57  ;;  %v70_v36 = vld [vmem:[%s1507_s0 + $0x68] sm:$0xff]  ;;  %v72_v37 = vld [vmem:[%s1507_s0 + $0x78] sm:$0xff]  ;;  %v69_v54 = vld [vmem:[%s1507_s0 + $0x60] sm:$0xff] }
  0x10   :  { %825 = vmatprep.subr.bf16.mxu0 %v953_v10  ;;  %933 = vmatprep.subr.bf16.mxu1 %v953_v10  ;;  %v139_v10 = vmul.f32 %v1033_v18, %v63_v61  ;;  %v169_v11 = vmul.f32 %v1033_v18, %v93_v62  ;;  %v171_v12 = vmul.f32 %v1033_v18, %v95_v63  ;;  %v102_v38 = vld [vmem:[%s1507_s0 + $0x168] sm:$0xff]  ;;  %v104_v39 = vld [vmem:[%s1507_s0 + $0x178] sm:$0xff] }
  0x11   :  { %561 = vmatprep.mubr.bf16.mxu1 %v322_v51  ;;  %v142_v15 = vmul.f32 %v1035_v19, %v66_v4  ;;  %v144_v16 = vmul.f32 %v1035_v19, %v68_v5  ;;  %v324_v17 = vpack.c.bf16 %v248_v3, %v246_v2  ;;  %v174_v20 = vmul.f32 %v1035_v19, %v98_v7  ;;  %v106_v2 = vld [vmem:[%s1507_s0 + $0x188] sm:$0xff]  ;;  %v108_v3 = vld [vmem:[%s1507_s0 + $0x198] sm:$0xff] }
  0x12   :  { %v176_v21 = vmul.f32 %v1035_v19, %v100_v8  ;;  %v213_v22 = vadd.f32 %v1046_v23, %v137_v9  ;;  %v215_v25 = vadd.f32 %v1046_v23, %v139_v10  ;;  %v245_v26 = vadd.f32 %v1046_v23, %v169_v11 }
  0x13   :  { %826 = vmatpush3.bf16.msra.mxu0 %v954_v13  ;;  %941 = vmatpush3.bf16.msra.mxu1 %v954_v13  ;;  %v321_v13 = vpack.c.bf16 %v243_v59, %v241_v58  ;;  %v218_v28 = vadd.f32 %v1048_v24, %v142_v15  ;;  %v220_v29 = vadd.f32 %v1048_v24, %v144_v16  ;;  %v71_v58 = vld [vmem:[%s1507_s0 + $0x70] sm:$0xff]  ;;  %v101_v59 = vld [vmem:[%s1507_s0 + $0x160] sm:$0xff] }
  0x14   :  { %827 = vmatprep.subr.bf16.mxu0 %v955_v14  ;;  %934 = vmatprep.subr.bf16.mxu1 %v955_v14  ;;  %v308_v14 = vpack.c.bf16 %v216_v1, %v214_v60  ;;  %v250_v32 = vadd.f32 %v1048_v24, %v174_v20  ;;  %v307_v40 = vpack.c.bf16 %v215_v25, %v213_v22  ;;  %v103_v60 = vld [vmem:[%s1507_s0 + $0x170] sm:$0xff]  ;;  %v76_v1 = vld [vmem:[%s1507_s0 + $0x98] sm:$0xff] }
  0x15   :  { %v141_v42 = vmul.f32 %v1033_v18, %v65_v30  ;;  %v143_v43 = vmul.f32 %v1033_v18, %v67_v31  ;;  %v310_v44 = vpack.c.bf16 %v220_v29, %v218_v28  ;;  %v173_v45 = vmul.f32 %v1033_v18, %v97_v34  ;;  %v105_v30 = vld [vmem:[%s1507_s0 + $0x180] sm:$0xff]  ;;  %v107_v31 = vld [vmem:[%s1507_s0 + $0x190] sm:$0xff]  ;;  %v110_v34 = vld [vmem:[%s1507_s0 + $0x1a8] sm:$0xff] }
  0x16   :  { %v175_v46 = vmul.f32 %v1033_v18, %v99_v35  ;;  %v148_v49 = vmul.f32 %v1035_v19, %v72_v37  ;;  %v180_v51 = vmul.f32 %v1035_v19, %v104_v39  ;;  %v145_v4 = vmul.f32 %v1033_v18, %v69_v54  ;;  %v112_v35 = vld [vmem:[%s1507_s0 + $0x1b8] sm:$0xff]  ;;  %v79_v54 = vld [vmem:[%s1507_s0 + $0xb0] sm:$0xff] }
  0x17   :  { %828 = vmatpush3.bf16.msra.mxu0 %v956_v27  ;;  %942 = vmatpush3.bf16.msra.mxu1 %v956_v27  ;;  %v247_v27 = vadd.f32 %v1046_v23, %v171_v12  ;;  %v217_v52 = vadd.f32 %v1046_v23, %v141_v42  ;;  %v219_v53 = vadd.f32 %v1046_v23, %v143_v43 }
  0x18   :  { %829 = vmatprep.subr.bf16.mxu0 %v957_v33  ;;  %935 = vmatprep.subr.bf16.mxu1 %v957_v33  ;;  %v252_v33 = vadd.f32 %v1048_v24, %v176_v21  ;;  %v249_v55 = vadd.f32 %v1046_v23, %v173_v45  ;;  %v251_v56 = vadd.f32 %v1046_v23, %v175_v46 }
  0x19   :  { %v323_v41 = vpack.c.bf16 %v247_v27, %v245_v26  ;;  %v224_v61 = vadd.f32 %v1048_v24, %v148_v49  ;;  %v256_v63 = vadd.f32 %v1048_v24, %v180_v51  ;;  %v147_v5 = vmul.f32 %v1033_v18, %v71_v58  ;;  %v73_v26 = vld [vmem:[%s1507_s0 + $0x80] sm:$0xff]  ;;  %v75_v27 = vld [vmem:[%s1507_s0 + $0x90] sm:$0xff] }
  0x1a   :  { %v326_v48 = vpack.c.bf16 %v252_v33, %v250_v32  ;;  %v179_v7 = vmul.f32 %v1033_v18, %v103_v60  ;;  %v309_v8 = vpack.c.bf16 %v219_v53, %v217_v52  ;;  %v325_v9 = vpack.c.bf16 %v251_v56, %v249_v55  ;;  %v78_v32 = vld [vmem:[%s1507_s0 + $0xa8] sm:$0xff]  ;;  %v80_v33 = vld [vmem:[%s1507_s0 + $0xb8] sm:$0xff]  ;;  %v109_v55 = vld [vmem:[%s1507_s0 + $0x1a0] sm:$0xff] }
  0x1b   :  { %830 = vmatpush3.bf16.msra.mxu0 %v958_v47  ;;  %943 = vmatpush3.bf16.msra.mxu1 %v958_v47  ;;  %v146_v47 = vmul.f32 %v1035_v19, %v70_v36  ;;  %v152_v11 = vmul.f32 %v1035_v19, %v76_v1  ;;  %v184_v15 = vmul.f32 %v1035_v19, %v108_v3  ;;  %v111_v56 = vld [vmem:[%s1507_s0 + $0x1b0] sm:$0xff]  ;;  %v82_v60 = vld [vmem:[%s1507_s0 + $0xc8] sm:$0xff] }
  0x1c   :  { %831 = vmatprep.subr.bf16.mxu0 %v959_v50  ;;  %936 = vmatprep.subr.bf16.mxu1 %v959_v50  ;;  %v178_v50 = vmul.f32 %v1035_v19, %v102_v38  ;;  %v221_v16 = vadd.f32 %v1046_v23, %v145_v4  ;;  %v255_v21 = vadd.f32 %v1046_v23, %v179_v7 }
  0x1d   :  { %v222_v57 = vadd.f32 %v1048_v24, %v146_v47  ;;  %v228_v25 = vadd.f32 %v1048_v24, %v152_v11  ;;  %v260_v29 = vadd.f32 %v1048_v24, %v184_v15  ;;  %v149_v38 = vmul.f32 %v1033_v18, %v73_v26  ;;  %v113_v26 = vld [vmem:[%s1507_s0 + $0x1c0] sm:$0xff] }
  0x1e   :  { %v254_v62 = vadd.f32 %v1048_v24, %v178_v50  ;;  %v151_v39 = vmul.f32 %v1033_v18, %v75_v27  ;;  %v183_v42 = vmul.f32 %v1033_v18, %v107_v31  ;;  %v154_v43 = vmul.f32 %v1035_v19, %v78_v32  ;;  %v77_v50 = vld [vmem:[%s1507_s0 + $0xa0] sm:$0xff]  ;;  %v115_v27 = vld [vmem:[%s1507_s0 + $0x1d0] sm:$0xff]  ;;  %v120_v31 = vld [vmem:[%s1507_s0 + $0x1f8] sm:$0xff] }
  0x1f   :  { %832 = vmatpush3.bf16.msra.mxu0 %v960_v0  ;;  %944 = vmatpush3.bf16.msra.mxu1 %v960_v0  ;;  %v74_v0 = vld [vmem:[%s1507_s0 + $0x88] sm:$0xff]  ;;  %v312_v12 = vpack.c.bf16 %v224_v61, %v222_v57  ;;  %v156_v45 = vmul.f32 %v1035_v19, %v80_v33  ;;  %v186_v46 = vmul.f32 %v1035_v19, %v110_v34  ;;  %v84_v61 = vld [vmem:[%s1507_s0 + $0xd8] sm:$0xff] }
  0x20   :  { %v150_v10 = vmul.f32 %v1035_v19, %v74_v0  ;;  %v188_v47 = vmul.f32 %v1035_v19, %v112_v35  ;;  %v227_v49 = vadd.f32 %v1046_v23, %v151_v39  ;;  %v259_v52 = vadd.f32 %v1046_v23, %v183_v42 }
  0x21   :  { %v230_v53 = vadd.f32 %v1048_v24, %v154_v43  ;;  %v232_v57 = vadd.f32 %v1048_v24, %v156_v45  ;;  %v262_v58 = vadd.f32 %v1048_v24, %v186_v46  ;;  %v153_v0 = vmul.f32 %v1033_v18, %v77_v50 }
  0x22   :  { %498 = vmatmul.mubr.bf16.vlgmr.msra.gmra.mrb[0].mxu0 %v305_v6  ;;  %562 = vmatmul.mubr.bf16.vlgmr.msra.gmra.mrb[0].mxu1 %v321_v13  ;;  %v177_v6 = vmul.f32 %v1033_v18, %v101_v59  ;;  %v328_v13 = vpack.c.bf16 %v256_v63, %v254_v62  ;;  %v226_v22 = vadd.f32 %v1048_v24, %v150_v10  ;;  %v114_v62 = vld [vmem:[%s1507_s0 + $0x1c8] sm:$0xff]  ;;  %v116_v63 = vld [vmem:[%s1507_s0 + $0x1d8] sm:$0xff] }
  0x23   :  { %505 = vmatprep.mubr.bf16.mxu0 %v308_v14  ;;  %569 = vmatprep.mubr.bf16.mxu1 %v324_v17  ;;  %v182_v14 = vmul.f32 %v1035_v19, %v106_v2  ;;  %v223_v17 = vadd.f32 %v1046_v23, %v147_v5  ;;  %v264_v59 = vadd.f32 %v1048_v24, %v188_v47 }
  0x24   :  { %v253_v20 = vadd.f32 %v1046_v23, %v177_v6  ;;  %v155_v1 = vmul.f32 %v1033_v18, %v79_v54  ;;  %v185_v2 = vmul.f32 %v1033_v18, %v109_v55  ;;  %v187_v3 = vmul.f32 %v1033_v18, %v111_v56  ;;  %v119_v54 = vld [vmem:[%s1507_s0 + $0x1f0] sm:$0xff] }
  0x25   :  { %v258_v28 = vadd.f32 %v1048_v24, %v182_v14  ;;  %v311_v36 = vpack.c.bf16 %v223_v17, %v221_v16  ;;  %v158_v6 = vmul.f32 %v1035_v19, %v82_v60  ;;  %v160_v7 = vmul.f32 %v1035_v19, %v84_v61 }
  0x26   :  { %v327_v37 = vpack.c.bf16 %v255_v21, %v253_v20  ;;  %v190_v10 = vmul.f32 %v1035_v19, %v114_v62  ;;  %v192_v11 = vmul.f32 %v1035_v19, %v116_v63  ;;  %v261_v14 = vadd.f32 %v1046_v23, %v185_v2  ;;  %v81_v20 = vld [vmem:[%s1507_s0 + $0xc0] sm:$0xff]  ;;  %v83_v21 = vld [vmem:[%s1507_s0 + $0xd0] sm:$0xff] }
  0x27   :  { %v263_v15 = vadd.f32 %v1046_v23, %v187_v3  ;;  %v234_v16 = vadd.f32 %v1048_v24, %v158_v6  ;;  %v236_v17 = vadd.f32 %v1048_v24, %v160_v7  ;;  %v157_v34 = vmul.f32 %v1033_v18, %v81_v20  ;;  %v1376_v6 = vld [vmem:[%s1510_s4] ss:$0 sm:$0xff] }
  0x28   :  { %v159_v35 = vmul.f32 %v1033_v18, %v83_v21  ;;  %v196_v43 = vmul.f32 %v1035_v19, %v120_v31 }
  0x29   :  { %v331_v33 = vpack.c.bf16 %v263_v15, %v261_v14 }
  0x2a   :  { %506 = vmatmul.mubr.bf16.gmra.mrb[4].mxu0 %v307_v40  ;;  %570 = vmatmul.mubr.bf16.gmra.mrb[4].mxu1 %v323_v41  ;;  %v314_v40 = vpack.c.bf16 %v228_v25, %v226_v22  ;;  %v181_v41 = vmul.f32 %v1033_v18, %v105_v30  ;;  %v266_v22 = vadd.f32 %v1048_v24, %v190_v10  ;;  %v118_v30 = vld [vmem:[%s1507_s0 + $0x1e8] sm:$0xff] }
  0x2b   :  { %513 = vmatprep.mubr.bf16.mxu0 %v310_v44  ;;  %577 = vmatprep.mubr.bf16.mxu1 %v326_v48  ;;  %v330_v44 = vpack.c.bf16 %v260_v29, %v258_v28  ;;  %v225_v48 = vadd.f32 %v1046_v23, %v149_v38  ;;  %v268_v25 = vadd.f32 %v1048_v24, %v192_v11  ;;  %v86_v28 = vld [vmem:[%s1507_s0 + $0xe8] sm:$0xff]  ;;  %v88_v29 = vld [vmem:[%s1507_s0 + $0xf8] sm:$0xff] }
  0x2c   :  { %v257_v51 = vadd.f32 %v1046_v23, %v181_v41  ;;  %v191_v38 = vmul.f32 %v1033_v18, %v115_v27  ;;  %v162_v39 = vmul.f32 %v1035_v19, %v86_v28  ;;  %v164_v41 = vmul.f32 %v1035_v19, %v88_v29 }
  0x2d   :  { %v313_v4 = vpack.c.bf16 %v227_v49, %v225_v48  ;;  %v194_v42 = vmul.f32 %v1035_v19, %v118_v30  ;;  %v235_v45 = vadd.f32 %v1046_v23, %v159_v35  ;;  %v85_v49 = vld [vmem:[%s1507_s0 + $0xe0] sm:$0xff] }
  0x2e   :  { %v329_v5 = vpack.c.bf16 %v259_v52, %v257_v51  ;;  %v267_v47 = vadd.f32 %v1046_v23, %v191_v38  ;;  %v238_v48 = vadd.f32 %v1048_v24, %v162_v39  ;;  %v240_v19 = vadd.f32 %v1048_v24, %v164_v41  ;;  %v87_v52 = vld [vmem:[%s1507_s0 + $0xf0] sm:$0xff] }
  0x2f   :  { %v270_v50 = vadd.f32 %v1048_v24, %v194_v42  ;;  %v272_v51 = vadd.f32 %v1048_v24, %v196_v43  ;;  %v161_v56 = vmul.f32 %v1033_v18, %v85_v49 }
  0x30   :  { %v320_v60 = vpack.c.bf16 %v240_v19, %v238_v48 }
  0x31   :  { %v336_v61 = vpack.c.bf16 %v272_v51, %v270_v50  ;;  %v237_v62 = vadd.f32 %v1046_v23, %v161_v56 }
  0x32   :  { %514 = vmatmul.mubr.bf16.gmra.mrb[8].mxu0 %v309_v8  ;;  %578 = vmatmul.mubr.bf16.gmra.mrb[8].mxu1 %v325_v9  ;;  %v316_v8 = vpack.c.bf16 %v232_v57, %v230_v53  ;;  %v332_v9 = vpack.c.bf16 %v264_v59, %v262_v58  ;;  %v117_v53 = vld [vmem:[%s1507_s0 + $0x1e0] sm:$0xff]  ;;  %v163_v58 = vmul.f32 %v1033_v18, %v87_v52 }
  0x33   :  { %521 = vmatprep.mubr.bf16.mxu0 %v312_v12  ;;  %585 = vmatprep.mubr.bf16.mxu1 %v328_v13  ;;  %v229_v12 = vadd.f32 %v1046_v23, %v153_v0  ;;  %v231_v13 = vadd.f32 %v1046_v23, %v155_v1  ;;  %v193_v24 = vmul.f32 %v1033_v18, %v117_v53 }
  0x34   :  { %v195_v59 = vmul.f32 %v1033_v18, %v119_v54  ;;  %v239_v63 = vadd.f32 %v1046_v23, %v163_v58 }
  0x35   :  { %v315_v32 = vpack.c.bf16 %v231_v13, %v229_v12  ;;  %v269_v0 = vadd.f32 %v1046_v23, %v193_v24 }
  0x36   :  { %v271_v1 = vadd.f32 %v1046_v23, %v195_v59  ;;  %v319_v2 = vpack.c.bf16 %v239_v63, %v237_v62 }
  0x38   :  { %v335_v3 = vpack.c.bf16 %v271_v1, %v269_v0 }
  0x3a   :  { %522 = vmatmul.mubr.bf16.gmra.mrb[12].mxu0 %v311_v36  ;;  %586 = vmatmul.mubr.bf16.gmra.mrb[12].mxu1 %v327_v37  ;;  %v318_v36 = vpack.c.bf16 %v236_v17, %v234_v16  ;;  %v189_v37 = vmul.f32 %v1033_v18, %v113_v26 }
  0x3b   :  { %529 = vmatprep.mubr.bf16.mxu0 %v314_v40  ;;  %593 = vmatprep.mubr.bf16.mxu1 %v330_v44  ;;  %v334_v40 = vpack.c.bf16 %v268_v25, %v266_v22  ;;  %v233_v44 = vadd.f32 %v1046_v23, %v157_v34 }
  0x3c   :  { %v265_v46 = vadd.f32 %v1046_v23, %v189_v37 }
  0x3d   :  { %v317_v55 = vpack.c.bf16 %v235_v45, %v233_v44 }
  0x3e   :  { %v333_v57 = vpack.c.bf16 %v267_v47, %v265_v46 }
  0x42   :  { %530 = vmatmul.mubr.bf16.gmra.mrb[16].mxu0 %v313_v4  ;;  %594 = vmatmul.mubr.bf16.gmra.mrb[16].mxu1 %v329_v5 }
  0x43   :  { %537 = vmatprep.mubr.bf16.mxu0 %v316_v8  ;;  %601 = vmatprep.mubr.bf16.mxu1 %v332_v9 }
  0x4a   :  { %538 = vmatmul.mubr.bf16.gmra.mrb[20].mxu0 %v315_v32  ;;  %602 = vmatmul.mubr.bf16.gmra.mrb[20].mxu1 %v331_v33 }
  0x4b   :  { %545 = vmatprep.mubr.bf16.mxu0 %v318_v36  ;;  %609 = vmatprep.mubr.bf16.mxu1 %v334_v40 }
  0x52   :  { %546 = vmatmul.mubr.bf16.gmra.mrb[24].mxu0 %v317_v55  ;;  %610 = vmatmul.mubr.bf16.gmra.mrb[24].mxu1 %v333_v57 }
  0x53   :  { %553 = vmatprep.mubr.bf16.mxu0 %v320_v60  ;;  %617 = vmatprep.mubr.bf16.mxu1 %v336_v61 }
  0x5a   :  { %554 = vmatmul.mubr.bf16.gmra.mrb[28].mxu0 %v319_v2  ;;  %618 = vmatmul.mubr.bf16.gmra.mrb[28].mxu1 %v335_v3 }
  0xf5   :  { %v833_v4 = vpop.f32.mrb[0].mxu0  ;;  %v881_v18 = vpop.f32.mrb[0].mxu1 }
  0xf6   :  { %v834_v5 = vpop.f32.mrb[1].mxu0  ;;  %v882_v7 = vpop.f32.mrb[1].mxu1 }
  0xf7   :  { %v835_v8 = vadd.f32 %v834_v5, %v833_v4  ;;  %v883_v9 = vadd.f32 %v882_v7, %v881_v18  ;;  %v836_v10 = vpop.f32.mrb[2].mxu0  ;;  %v884_v11 = vpop.f32.mrb[2].mxu1 }
  0xf8   :  { %v837_v23 = vpop.f32.mrb[3].mxu0  ;;  %v885_v12 = vpop.f32.mrb[3].mxu1 }
  0xf9   :  { %v732_v13 = vadd.f32 %v835_v8, %v1376_v6  ;;  %v748_v14 = vadd.f32 %v883_v9, %v1376_v6  ;;  %v838_v15 = vadd.f32 %v837_v23, %v836_v10  ;;  %v886_v16 = vadd.f32 %v885_v12, %v884_v11 }
  0xfb   :  { %764 = vst [vmem:[%s1511_s5] sm:$0xff] %v732_v13  ;;  %780 = vst [vmem:[%s1511_s5 + $0x80] sm:$0xff] %v748_v14  ;;  %v733_v17 = vadd.f32 %v838_v15, %v1376_v6  ;;  %v749_v20 = vadd.f32 %v886_v16, %v1376_v6 }
  0xfd   :  { %765 = vst [vmem:[%s1511_s5 + $0x8] sm:$0xff] %v733_v17  ;;  %781 = vst [vmem:[%s1511_s5 + $0x88] sm:$0xff] %v749_v20  ;;  %v839_v21 = vpop.f32.mrb[4].mxu0  ;;  %v887_v22 = vpop.f32.mrb[4].mxu1 }
  0xfe   :  { %v840_v25 = vpop.f32.mrb[5].mxu0  ;;  %v888_v26 = vpop.f32.mrb[5].mxu1 }
  0xff   :  { %v841_v27 = vadd.f32 %v840_v25, %v839_v21  ;;  %v889_v28 = vadd.f32 %v888_v26, %v887_v22  ;;  %v842_v29 = vpop.f32.mrb[6].mxu0  ;;  %v890_v30 = vpop.f32.mrb[6].mxu1 }
 0x100   :  { %v843_v31 = vpop.f32.mrb[7].mxu0  ;;  %v891_v32 = vpop.f32.mrb[7].mxu1 }
 0x101   :  { %v734_v33 = vadd.f32 %v841_v27, %v1376_v6  ;;  %v750_v34 = vadd.f32 %v889_v28, %v1376_v6  ;;  %v844_v35 = vadd.f32 %v843_v31, %v842_v29  ;;  %v892_v36 = vadd.f32 %v891_v32, %v890_v30 }
 0x103   :  { %766 = vst [vmem:[%s1511_s5 + $0x10] sm:$0xff] %v734_v33  ;;  %782 = vst [vmem:[%s1511_s5 + $0x90] sm:$0xff] %v750_v34  ;;  %v735_v37 = vadd.f32 %v844_v35, %v1376_v6  ;;  %v751_v38 = vadd.f32 %v892_v36, %v1376_v6 }
 0x105   :  { %767 = vst [vmem:[%s1511_s5 + $0x18] sm:$0xff] %v735_v37  ;;  %783 = vst [vmem:[%s1511_s5 + $0x98] sm:$0xff] %v751_v38  ;;  %v845_v39 = vpop.f32.mrb[8].mxu0  ;;  %v893_v40 = vpop.f32.mrb[8].mxu1 }
 0x106   :  { %v846_v41 = vpop.f32.mrb[9].mxu0  ;;  %v894_v42 = vpop.f32.mrb[9].mxu1 }
 0x107   :  { %v847_v43 = vadd.f32 %v846_v41, %v845_v39  ;;  %v895_v44 = vadd.f32 %v894_v42, %v893_v40  ;;  %v848_v45 = vpop.f32.mrb[10].mxu0  ;;  %v896_v46 = vpop.f32.mrb[10].mxu1 }
 0x108   :  { %v849_v47 = vpop.f32.mrb[11].mxu0  ;;  %v897_v48 = vpop.f32.mrb[11].mxu1 }
 0x109   :  { %v736_v49 = vadd.f32 %v847_v43, %v1376_v6  ;;  %v752_v19 = vadd.f32 %v895_v44, %v1376_v6  ;;  %v850_v50 = vadd.f32 %v849_v47, %v848_v45  ;;  %v898_v51 = vadd.f32 %v897_v48, %v896_v46 }
 0x10b   :  { %768 = vst [vmem:[%s1511_s5 + $0x20] sm:$0xff] %v736_v49  ;;  %784 = vst [vmem:[%s1511_s5 + $0xa0] sm:$0xff] %v752_v19  ;;  %v737_v52 = vadd.f32 %v850_v50, %v1376_v6  ;;  %v753_v53 = vadd.f32 %v898_v51, %v1376_v6 }
 0x10d   :  { %769 = vst [vmem:[%s1511_s5 + $0x28] sm:$0xff] %v737_v52  ;;  %785 = vst [vmem:[%s1511_s5 + $0xa8] sm:$0xff] %v753_v53  ;;  %v851_v54 = vpop.f32.mrb[12].mxu0  ;;  %v899_v55 = vpop.f32.mrb[12].mxu1 }
 0x10e   :  { %v852_v56 = vpop.f32.mrb[13].mxu0  ;;  %v900_v57 = vpop.f32.mrb[13].mxu1 }
 0x10f   :  { %v853_v58 = vadd.f32 %v852_v56, %v851_v54  ;;  %v901_v24 = vadd.f32 %v900_v57, %v899_v55  ;;  %v854_v59 = vpop.f32.mrb[14].mxu0  ;;  %v902_v60 = vpop.f32.mrb[14].mxu1 }
 0x110   :  { %v855_v61 = vpop.f32.mrb[15].mxu0  ;;  %v903_v62 = vpop.f32.mrb[15].mxu1 }
 0x111   :  { %v738_v63 = vadd.f32 %v853_v58, %v1376_v6  ;;  %v754_v0 = vadd.f32 %v901_v24, %v1376_v6  ;;  %v856_v1 = vadd.f32 %v855_v61, %v854_v59  ;;  %v904_v2 = vadd.f32 %v903_v62, %v902_v60 }
 0x113   :  { %770 = vst [vmem:[%s1511_s5 + $0x30] sm:$0xff] %v738_v63  ;;  %786 = vst [vmem:[%s1511_s5 + $0xb0] sm:$0xff] %v754_v0  ;;  %v739_v3 = vadd.f32 %v856_v1, %v1376_v6  ;;  %v755_v4 = vadd.f32 %v904_v2, %v1376_v6 }
 0x115   :  { %771 = vst [vmem:[%s1511_s5 + $0x38] sm:$0xff] %v739_v3  ;;  %787 = vst [vmem:[%s1511_s5 + $0xb8] sm:$0xff] %v755_v4  ;;  %v857_v18 = vpop.f32.mrb[16].mxu0  ;;  %v905_v5 = vpop.f32.mrb[16].mxu1 }
 0x116   :  { %v858_v7 = vpop.f32.mrb[17].mxu0  ;;  %v906_v8 = vpop.f32.mrb[17].mxu1 }
 0x117   :  { %v859_v9 = vadd.f32 %v858_v7, %v857_v18  ;;  %v907_v10 = vadd.f32 %v906_v8, %v905_v5  ;;  %v860_v11 = vpop.f32.mrb[18].mxu0  ;;  %v908_v23 = vpop.f32.mrb[18].mxu1 }
 0x118   :  { %v861_v12 = vpop.f32.mrb[19].mxu0  ;;  %v909_v13 = vpop.f32.mrb[19].mxu1 }
 0x119   :  { %v740_v14 = vadd.f32 %v859_v9, %v1376_v6  ;;  %v756_v15 = vadd.f32 %v907_v10, %v1376_v6  ;;  %v862_v16 = vadd.f32 %v861_v12, %v860_v11  ;;  %v910_v17 = vadd.f32 %v909_v13, %v908_v23 }
 0x11b   :  { %772 = vst [vmem:[%s1511_s5 + $0x40] sm:$0xff] %v740_v14  ;;  %788 = vst [vmem:[%s1511_s5 + $0xc0] sm:$0xff] %v756_v15  ;;  %v741_v20 = vadd.f32 %v862_v16, %v1376_v6  ;;  %v757_v21 = vadd.f32 %v910_v17, %v1376_v6 }
 0x11d   :  { %773 = vst [vmem:[%s1511_s5 + $0x48] sm:$0xff] %v741_v20  ;;  %789 = vst [vmem:[%s1511_s5 + $0xc8] sm:$0xff] %v757_v21  ;;  %v863_v22 = vpop.f32.mrb[20].mxu0  ;;  %v911_v25 = vpop.f32.mrb[20].mxu1 }
 0x11e   :  { %v864_v26 = vpop.f32.mrb[21].mxu0  ;;  %v912_v27 = vpop.f32.mrb[21].mxu1 }
 0x11f   :  { %v865_v28 = vadd.f32 %v864_v26, %v863_v22  ;;  %v913_v29 = vadd.f32 %v912_v27, %v911_v25  ;;  %v866_v30 = vpop.f32.mrb[22].mxu0  ;;  %v914_v31 = vpop.f32.mrb[22].mxu1 }
 0x120   :  { %v867_v32 = vpop.f32.mrb[23].mxu0  ;;  %v915_v33 = vpop.f32.mrb[23].mxu1 }
 0x121   :  { %v742_v34 = vadd.f32 %v865_v28, %v1376_v6  ;;  %v758_v35 = vadd.f32 %v913_v29, %v1376_v6  ;;  %v868_v36 = vadd.f32 %v867_v32, %v866_v30  ;;  %v916_v37 = vadd.f32 %v915_v33, %v914_v31 }
 0x123   :  { %774 = vst [vmem:[%s1511_s5 + $0x50] sm:$0xff] %v742_v34  ;;  %790 = vst [vmem:[%s1511_s5 + $0xd0] sm:$0xff] %v758_v35  ;;  %v743_v38 = vadd.f32 %v868_v36, %v1376_v6  ;;  %v759_v39 = vadd.f32 %v916_v37, %v1376_v6 }
 0x125   :  { %775 = vst [vmem:[%s1511_s5 + $0x58] sm:$0xff] %v743_v38  ;;  %791 = vst [vmem:[%s1511_s5 + $0xd8] sm:$0xff] %v759_v39  ;;  %v869_v40 = vpop.f32.mrb[24].mxu0  ;;  %v917_v41 = vpop.f32.mrb[24].mxu1 }
 0x126   :  { %v870_v42 = vpop.f32.mrb[25].mxu0  ;;  %v918_v43 = vpop.f32.mrb[25].mxu1 }
 0x127   :  { %v871_v44 = vadd.f32 %v870_v42, %v869_v40  ;;  %v919_v45 = vadd.f32 %v918_v43, %v917_v41  ;;  %v872_v46 = vpop.f32.mrb[26].mxu0  ;;  %v920_v47 = vpop.f32.mrb[26].mxu1 }
 0x128   :  { %v873_v48 = vpop.f32.mrb[27].mxu0  ;;  %v921_v49 = vpop.f32.mrb[27].mxu1 }
 0x129   :  { %v744_v19 = vadd.f32 %v871_v44, %v1376_v6  ;;  %v760_v50 = vadd.f32 %v919_v45, %v1376_v6  ;;  %v874_v51 = vadd.f32 %v873_v48, %v872_v46  ;;  %v922_v52 = vadd.f32 %v921_v49, %v920_v47 }
 0x12b   :  { %776 = vst [vmem:[%s1511_s5 + $0x60] sm:$0xff] %v744_v19  ;;  %792 = vst [vmem:[%s1511_s5 + $0xe0] sm:$0xff] %v760_v50  ;;  %v745_v53 = vadd.f32 %v874_v51, %v1376_v6  ;;  %v761_v54 = vadd.f32 %v922_v52, %v1376_v6 }
 0x12d   :  { %777 = vst [vmem:[%s1511_s5 + $0x68] sm:$0xff] %v745_v53  ;;  %793 = vst [vmem:[%s1511_s5 + $0xe8] sm:$0xff] %v761_v54  ;;  %v875_v55 = vpop.f32.mrb[28].mxu0  ;;  %v923_v56 = vpop.f32.mrb[28].mxu1 }
 0x12e   :  { %v876_v57 = vpop.f32.mrb[29].mxu0  ;;  %v924_v58 = vpop.f32.mrb[29].mxu1 }
 0x12f   :  { %v877_v24 = vadd.f32 %v876_v57, %v875_v55  ;;  %v925_v59 = vadd.f32 %v924_v58, %v923_v56  ;;  %v878_v60 = vpop.f32.mrb[30].mxu0  ;;  %v926_v61 = vpop.f32.mrb[30].mxu1 }
 0x130   :  { %v879_v62 = vpop.f32.mrb[31].mxu0  ;;  %v927_v63 = vpop.f32.mrb[31].mxu1 }
 0x131   :  { %v746_v0 = vadd.f32 %v877_v24, %v1376_v6  ;;  %v762_v1 = vadd.f32 %v925_v59, %v1376_v6  ;;  %v880_v2 = vadd.f32 %v879_v62, %v878_v60  ;;  %v928_v3 = vadd.f32 %v927_v63, %v926_v61 }
 0x133   :  { %778 = vst [vmem:[%s1511_s5 + $0x70] sm:$0xff] %v746_v0  ;;  %794 = vst [vmem:[%s1511_s5 + $0xf0] sm:$0xff] %v762_v1  ;;  %v747_v4 = vadd.f32 %v880_v2, %v1376_v6  ;;  %v763_v18 = vadd.f32 %v928_v3, %v1376_v6 }
 0x135   :  { %779 = vst [vmem:[%s1511_s5 + $0x78] sm:$0xff] %v747_v4  ;;  %795 = vst [vmem:[%s1511_s5 + $0xf8] sm:$0xff] %v763_v18 }

</bundles_post_ra>
